<compile_context>
chip_gen: v7x
topology: tpu7x:2x2x1
jax: 0.10.0
libtpu: 0.0.40
codegen_flags: <defaults>
</compile_context>

<pallas_src>
import math

import jax
import jax.numpy as jnp
from jax.experimental import pallas as pl
from jax.experimental.pallas import tpu as pltpu


def _drop_path_kernel(x_ref, mask_ref, o_ref):
    """o = x * mask, with mask broadcast over the per-sample feature tile."""
    o_ref[...] = x_ref[...] * mask_ref[...]


def _largest_divisor_le(n, max_val):
    """Largest d with d | n and d <= max_val (>= 1)."""
    d = max(1, min(n, int(max_val)))
    while n % d != 0:
        d -= 1
    return d


def _aligned_divisor_tile(n, max_tile, align):
    """Largest t <= max_tile with t % align == 0 and n % t == 0; fallback n."""
    if n <= max_tile:
        return n
    t = (int(max_tile) // align) * align
    while t >= align:
        if n % t == 0:
            return t
        t -= align
    return n


def drop_path_pallas(x, drop_prob=0.0, training=False, scale_by_keep=True, seed=0):
    """Matches torch drop_path(x, drop_prob, training, scale_by_keep) semantics."""
    if drop_prob == 0.0 or not training:
        return x
    keep_prob = 1.0 - drop_prob

    orig_shape = x.shape
    B = x.shape[0]
    F = int(math.prod(x.shape[1:])) if x.ndim > 1 else 1

    # Per-sample keep / scale vector, computed once in the wrapper (out of the
    # hot loop), multiplied in the input's native dtype (matches PyTorch).
    scale = (1.0 / keep_prob) if (keep_prob > 0.0 and scale_by_keep) else 1.0
    key = jax.random.PRNGKey(seed)
    keep = jax.random.bernoulli(key, p=keep_prob, shape=(B,))
    mask = keep.astype(x.dtype) * jnp.asarray(scale, dtype=x.dtype)

    itemsize = jnp.dtype(x.dtype).itemsize
    target_bytes = 2 << 20  # ~2 MiB per x block (double-buffered -> well under VMEM)

    if F % 128 == 0:
        # Lane-dense path: (B, rows, 128), last two block dims satisfy (8,128).
        rows = F // 128
        x3 = x.reshape(B, rows, 128)
        mask3 = mask.reshape(B, 1, 1)

        row_bytes = 128 * itemsize
        sample_bytes = rows * row_bytes
        if sample_bytes >= target_bytes:
            # Large samples: one sample per block, tile the rows (sublane) axis.
            bt = 1
            rt = _aligned_divisor_tile(rows, max(8, target_bytes // row_bytes), 8)
        else:
            # Small samples: pack several samples per block.
            bt = _largest_divisor_le(B, max(1, target_bytes // max(sample_bytes, 1)))
            rt = rows
        grid = (B // bt, rows // rt)

        out = pl.pallas_call(
            _drop_path_kernel,
            out_shape=jax.ShapeDtypeStruct((B, rows, 128), x.dtype),
            grid=grid,
            in_specs=[
                pl.BlockSpec((bt, rt, 128), lambda b, r: (b, r, 0)),
                pl.BlockSpec((bt, 1, 1), lambda b, r: (b, 0, 0)),
            ],
            out_specs=pl.BlockSpec((bt, rt, 128), lambda b, r: (b, r, 0)),
            compiler_params=pltpu.CompilerParams(
                dimension_semantics=("parallel", "parallel"),
            ),
        )(x3, mask3)
        return out.reshape(orig_shape)

    # Ragged fallback: keep the whole feature axis as one full-extent block
    # (legal since block dim == array dim); avoids a pad + slice HBM pass.
    # TODO(synk): for huge ragged F, tile F with an in-kernel masked tail store
    # instead of relying on full-extent blocks.
    x2 = x.reshape(B, F)
    mask2 = mask.reshape(B, 1)
    sample_bytes = max(F * itemsize, 1)
    if B * sample_bytes <= (8 << 20):
        bt = B  # whole batch in one block
    else:
        bt = _aligned_divisor_tile(B, max(8, target_bytes // sample_bytes), 8)
    grid = (B // bt,)

    out = pl.pallas_call(
        _drop_path_kernel,
        out_shape=jax.ShapeDtypeStruct((B, F), x.dtype),
        grid=grid,
        in_specs=[
            pl.BlockSpec((bt, F), lambda b: (b, 0)),
            pl.BlockSpec((bt, 1), lambda b: (b, 0)),
        ],
        out_specs=pl.BlockSpec((bt, F), lambda b: (b, 0)),
        compiler_params=pltpu.CompilerParams(
            dimension_semantics=("parallel",),
        ),
    )(x2, mask2)
    return out.reshape(orig_shape)


class DropPath:
    """Drop paths (Stochastic Depth) per sample — Pallas TPU implementation."""

    def __init__(self, drop_prob=None, scale_by_keep=True):
        self.drop_prob = 0.0 if drop_prob is None else float(drop_prob)
        self.scale_by_keep = scale_by_keep
        self.training = True  # mimic nn.Module.training flag

    def __call__(self, x, mask=None, seed=0):
        # `mask` argument is unused by the reference forward as well.
        return drop_path_pallas(
            x, self.drop_prob, self.training, self.scale_by_keep, seed=seed
        )


if __name__ == "__main__":
    key = jax.random.PRNGKey(0)
    x = jax.random.normal(key, (2, 4, 16, 16), dtype=jnp.float32)

    # Eval mode / drop_prob==0 -> identity (matches torch path).
    mod_eval = DropPath(drop_prob=0.5)
    mod_eval.training = False
    y_eval = jax.block_until_ready(mod_eval(x))
    assert jnp.allclose(y_eval, x)

    # Training mode: each sample is either dropped (all zeros) or kept & scaled.
    mod = DropPath(drop_prob=0.5, scale_by_keep=True)
    mod.training = True
    y = jax.block_until_ready(mod(x, seed=123))
    assert y.shape == x.shape and y.dtype == x.dtype

    keep_prob = 0.5
    for b in range(x.shape[0]):
        yb = y[b]
        is_dropped = bool(jnp.all(jnp.abs(yb) == 0.0))
        is_kept = bool(jnp.allclose(yb, x[b] / keep_prob, atol=1e-5))
        assert is_dropped or is_kept, "per-sample output must be 0 or x/keep_prob"

    # scale_by_keep=False path: kept samples pass through unscaled.
    mod2 = DropPath(drop_prob=0.25, scale_by_keep=False)
    y2 = jax.block_until_ready(mod2(x, seed=7))
    for b in range(x.shape[0]):
        yb = y2[b]
        is_dropped = bool(jnp.all(jnp.abs(yb) == 0.0))
        is_kept = bool(jnp.allclose(yb, x[b], atol=1e-6))
        assert is_dropped or is_kept

    # Ragged feature-size fallback (F % 128 != 0) exercises the 2D path.
    xr = jax.random.normal(jax.random.PRNGKey(1), (2, 3, 5, 7), dtype=jnp.float32)
    mod3 = DropPath(drop_prob=0.5, scale_by_keep=True)
    y3 = jax.block_until_ready(mod3(xr, seed=42))
    assert y3.shape == xr.shape
    for b in range(xr.shape[0]):
        yb = y3[b]
        is_dropped = bool(jnp.all(jnp.abs(yb) == 0.0))
        is_kept = bool(jnp.allclose(yb, xr[b] / 0.5, atol=1e-5))
        assert is_dropped or is_kept

    print("KERNEL_OK")
</pallas_src>

<mosaic_0001>
module attributes {stable_mosaic.version = 11 : i64} {
  func.func @_drop_path_kernel(%arg0: i32, %arg1: i32, %arg2: memref<2x8x128xf32, #tpu.memory_space<vmem>>, %arg3: memref<2x1x1xf32, #tpu.memory_space<vmem>>, %arg4: memref<2x8x128xf32, #tpu.memory_space<vmem>>) attributes {dimension_semantics = [#tpu.dimension_semantics<parallel>, #tpu.dimension_semantics<parallel>], iteration_bounds = array<i64: 1, 1>, scalar_prefetch = 0 : i64, scratch_operands = 0 : i64, tpu.core_type = #tpu.core_type<tc>, window_params = [{transform_indices = @transform_0, window_bounds = array<i64: 2, 8, 128>}, {transform_indices = @transform_1, window_bounds = array<i64: 2, 1, 1>}, {transform_indices = @transform_2, window_bounds = array<i64: 2, 8, 128>}]} {
    %c0 = arith.constant 0 : index
    %c0_0 = arith.constant 0 : index
    %c0_1 = arith.constant 0 : index
    %0 = vector.load %arg2[%c0, %c0_0, %c0_1] : memref<2x8x128xf32, #tpu.memory_space<vmem>>, vector<2x8x128xf32>
    %c0_2 = arith.constant 0 : index
    %c0_3 = arith.constant 0 : index
    %c0_4 = arith.constant 0 : index
    %1 = vector.load %arg3[%c0_2, %c0_3, %c0_4] : memref<2x1x1xf32, #tpu.memory_space<vmem>>, vector<2x1x1xf32>
    %2 = vector.broadcast %1 : vector<2x1x1xf32> to vector<2x8x128xf32>
    %3 = arith.mulf %0, %2 : vector<2x8x128xf32>
    %c0_5 = arith.constant 0 : index
    %c0_6 = arith.constant 0 : index
    %c0_7 = arith.constant 0 : index
    %4 = vector.load %arg4[%c0_5, %c0_6, %c0_7] : memref<2x8x128xf32, #tpu.memory_space<vmem>>, vector<2x8x128xf32>
    tpu.vector_store %arg4[%c0_5, %c0_6, %c0_7], %3 {strides = array<i32>} : memref<2x8x128xf32, #tpu.memory_space<vmem>>, vector<2x8x128xf32>,
    return
  }
  func.func @transform_0(%arg0: i32, %arg1: i32) -> (i32, i32, i32) {
    %c0_i32 = arith.constant 0 : i32
    %c0_i32_0 = arith.constant 0 : i32
    return %arg0, %arg1, %c0_i32 : i32, i32, i32
  }
  func.func @transform_1(%arg0: i32, %arg1: i32) -> (i32, i32, i32) {
    %c0_i32 = arith.constant 0 : i32
    %c0_i32_0 = arith.constant 0 : i32
    %c0_i32_1 = arith.constant 0 : i32
    return %arg0, %c0_i32, %c0_i32_0 : i32, i32, i32
  }
  func.func @transform_2(%arg0: i32, %arg1: i32) -> (i32, i32, i32) {
    %c0_i32 = arith.constant 0 : i32
    %c0_i32_0 = arith.constant 0 : i32
    return %arg0, %arg1, %c0_i32 : i32, i32, i32
  }
}

</mosaic_0001>

<bundles_post_ra>
// kernel: tpu_custom_call.1
= control target key start
LH: loop header
LB: loop body
LE: loop exit
PB: predicated region body
PF: predicated region fallthrough
CT: control target
= control target key end

     0   :  { %7 = vsyncpa [#allocation3], 0  ;;  %s181_s0 = inlined_call_operand.hbm [shape: f32[2,8,128], index: 0, kind: input, shape index: {}]   ;;  %s182_s1 = inlined_call_operand.vmem [shape: f32[2,1,1], index: 1, kind: input, shape index: {}]   ;;  %s183_s2 = inlined_call_operand.hbm [shape: f32[2,8,128], index: 2, kind: output, shape index: {}]  }
   0x1   :  { %8 = vsyncpa [#allocation4], 0  ;;  %s125_s9 = smov [#allocation2]   ;;  %s77_s13 = scalar_lea.hbm %s181_s0, 256 }
   0x2   :  { %s14_s10 = sshll.u32 %s125_s9, 4  ;;  %p78_p0 = scmp.ne.s32.totalorder %s181_s0, %s77_s13  ;;  %s15_s10 = int_to_ptr.vmem [resolvable:$true] %s14_s10 }
   0x3   :  { %p81_p1 = scmp.lt.u32.totalorder %s77_s13, %s181_s0 }
   0x5   :  { %p83_p2 = pnand %p81_p1, %p78_p0 }
   0x7   :  { %86 = shalt.err (!%p83_p2)
}
   0x8   :  { %s87_s18 = scalar_lea.vmem %s15_s10, 256  ;;  %p92_p4 = scmp.lt.s32.totalorder %s15_s10, %s15_s10 }
   0x9   :  { %p88_p3 = scmp.ne.s32.totalorder %s15_s10, %s87_s18  ;;  %p93_p5 = scmp.lt.s32.totalorder %s87_s18, %s87_s18 }
   0xb   :  { %p94_p6 = por %p93_p5, %p92_p4 }
   0xd   :  { %p95_p7 = pnand %p94_p6, %p88_p3 }
   0xf   :  { %98 = shalt.err (!%p95_p7)
}
  0x10   :  { %s126_s19 = smov 128   ;;  %s127_s20 = smov 8  }
  0x11   :  { %20 = dma.hbm_to_vmem [thread:$0]  %s181_s0, 256, %s15_s10, [#allocation3], %s126_s19, %s126_s19, %s127_s20  }
  0x12   :  { %121 = dma.done.wait [#allocation3], 256  }
  0x13   :  { %122 = vsyncadd [#allocation3], 4294967040  ;;  %v128_v0 = vmov 0   ;;  %v69_v1 = vld [vmem:[%s182_s1] ss:$0 sm:$0xff]  ;;  %v27_v6 = vld [vmem:[#allocation2 + $0x8] sm:$0xff] }
  0x14   :  { %76 = vset.pattern.permute.xlu0 %v128_v0  ;;  %v70_v2 = vld [vmem:[%s182_s1 + $0x1] ss:$0 sm:$0xff]  ;;  %s129_s27 = smov [#allocation5]  }
  0x15   :  { %41 = vperm.xlu0 %76, %v69_v1   ;;  %v26_v3 = vld [vmem:[#allocation2] sm:$0xff]  ;;  %s57_s0 = sshll.u32 %s129_s27, 4  ;;  %s58_s0 = int_to_ptr.vmem [resolvable:$true] %s57_s0 }
  0x16   :  { %s99_s28 = scalar_lea.vmem %s58_s0, 256  ;;  %p104_p9 = scmp.lt.s32.totalorder %s58_s0, %s58_s0 }
  0x17   :  { %p100_p8 = scmp.ne.s32.totalorder %s58_s0, %s99_s28  ;;  %p105_p10 = scmp.lt.s32.totalorder %s99_s28, %s99_s28 }
  0x19   :  { %45 = vperm.xlu0 %76, %v70_v2   ;;  %p106_p11 = por %p105_p10, %p104_p9 }
  0x1b   :  { %p107_p12 = pnand %p106_p11, %p100_p8 }
  0x94   :  { %v42_v4 = vpop.permute.xlu0 %41 }
  0x95   :  { %v48_v5 = vmul.f32 %v42_v4, %v26_v3 }
  0x97   :  { %50 = vst [vmem:[#allocation5] sm:$0xff] %v48_v5 }
  0x98   :  { %v46_v7 = vpop.permute.xlu0 %45 }
  0x99   :  { %v49_v8 = vmul.f32 %v46_v7, %v27_v6 }
  0x9b   :  { %51 = vst [vmem:[#allocation5 + $0x8] sm:$0xff] %v49_v8 }
  0x9c   :  { %110 = shalt.err (!%p107_p12)
}
  0x9d   :  { %s111_s30 = scalar_lea.hbm %s183_s2, 256 }
  0x9e   :  { %p112_p13 = scmp.ne.s32.totalorder %s183_s2, %s111_s30  ;;  %p115_p0 = scmp.lt.u32.totalorder %s111_s30, %s183_s2 }
  0xa0   :  { %p117_p1 = pnand %p115_p0, %p112_p13 }
  0xa2   :  { %120 = shalt.err (!%p117_p1)
}
  0xa3   :  { %63 = dma.vmem_to_hbm [thread:$0]  %s58_s0, 256, %s183_s2, [#allocation4], %s126_s19, %s126_s19, %s127_s20  }
  0xa4   :  { %123 = dma.done.wait [#allocation4], 256  }
  0xa5   :  { %124 = vsyncadd [#allocation4], 4294967040 }
  0xa6   :  { %67 = vsyncpa [#allocation3], 1 }
  0xa7   :  { %68 = vsyncpa [#allocation4], 1 }

</bundles_post_ra>
